<compile_context>
chip_gen: v7x
topology: tpu7x:2x2x1
jax: 0.10.0
libtpu: 0.0.40
codegen_flags: <defaults>
</compile_context>

<pallas_src>
import math

import jax
import jax.numpy as jnp
from jax.experimental import pallas as pl
from jax.experimental.pallas import tpu as pltpu


def attention_kernel(x_ref, w_ref, b_ref, out_ref):
    # x_ref: (TB, S, F) input dtype; w_ref: (1, 1, F) f32; b_ref: (1, S, 1) f32
    x = x_ref[...]            # stays in input dtype (no full-tile f32 upcast)
    w = w_ref[...]            # f32, resident across grid steps
    b = b_ref[...]            # f32, resident across grid steps

    # eij = mm(x.view(-1, F), weight).view(-1, S) + b, done as a VPU multiply
    # plus an in-lane reduce (a width-1 MXU matmul would waste the MXU).  The
    # keepdims form keeps S on sublanes so everything downstream is pure
    # broadcast -- no lane<->sublane relayout of the attention weights.
    eij = jnp.sum(x * w, axis=-1, keepdims=True, dtype=jnp.float32)   # (TB,S,1)
    eij = jnp.tanh(eij + b)                                           # (TB,S,1)
    a = jnp.exp(eij)          # tanh bounds eij in [-1,1]; no max-subtraction needed

    denom = jnp.sum(a, axis=1, keepdims=True)                         # (TB,1,1)
    # NOTE: the +1e-10 is added AFTER the division, matching the PyTorch module.
    a = a * pl.reciprocal(denom, approx=True) + 1e-10                 # EUP slot

    # Weighted sum over the step axis: lane-broadcast multiply, f32 accumulate.
    out = jnp.sum(x * a, axis=1, dtype=jnp.float32)                   # (TB, F)
    out_ref[...] = out.astype(out_ref.dtype)


def _round_up(n, m):
    return ((n + m - 1) // m) * m


def _vmem_capacity_bytes():
    try:
        return int(pltpu.get_tpu_info().vmem_capacity_bytes)
    except Exception:
        return 64 * 1024 * 1024   # conservative (v7x-sized) fallback


def attention_forward(x, weight, bias, *, block_batch=None, vmem_limit_bytes=None):
    """x: (B, S, F), weight: (F, 1), bias: (S,) -> (B, F)."""
    B, S, F = x.shape
    dtype = x.dtype

    vmem_cap = _vmem_capacity_bytes()
    small_vmem = vmem_cap <= 64 * 1024 * 1024   # v7x-class: 64 MiB/TC, 2 TCs/chip

    if vmem_limit_bytes is None:
        # Peak per step ~= 2 x-tile buffers (double-buffer) + at most one
        # f32-tile-sized temp + small out/param buffers; keep >=16 MiB headroom
        # below the physical capacity of the part.
        vmem_limit_bytes = (48 if small_vmem else 96) * 1024 * 1024

    if block_batch is None:
        # x-tile target: 8 MiB on 64 MiB parts, 16 MiB on 128 MiB parts.  Large
        # tiles amortize the ~0.35 us per-grid-step overhead and keep the DMAs
        # near the HBM roofline; the kernel is bandwidth-bound everywhere.
        x_tile_target = (8 if small_vmem else 16) * 1024 * 1024
        bytes_per_row = S * F * x.dtype.itemsize
        tb = x_tile_target // max(int(bytes_per_row), 1)
        tb = max(8, (tb // 8) * 8)
        block_batch = min(tb, _round_up(B, 8))
        if small_vmem and B > 8 and block_batch >= _round_up(B, 8):
            # 2-TC parts: guarantee >= 2 grid steps so the "parallel" batch
            # axis actually shards across both TensorCores.
            block_batch = min(block_batch, _round_up(pl.cdiv(B, 2), 8))
    block_batch = max(8, _round_up(block_batch, 8))   # sublane-aligned batch tile

    B_pad = _round_up(B, block_batch)
    if B_pad != B:
        # Zero padding is numerically safe (exp(tanh(0 + b)) > 0, so no NaNs);
        # the padded rows are sliced off below.
        x = jnp.pad(x, ((0, B_pad - B), (0, 0), (0, 0)))

    # Parameters stay float32 (matching the PyTorch module); they are ~one vreg
    # each and their constant index_maps keep a single resident VMEM copy.
    w3 = weight.reshape(1, 1, F).astype(jnp.float32)
    b3 = bias.reshape(1, S, 1).astype(jnp.float32)

    grid = (B_pad // block_batch,)

    out = pl.pallas_call(
        attention_kernel,
        out_shape=jax.ShapeDtypeStruct((B_pad, F), dtype),
        grid=grid,
        in_specs=[
            pl.BlockSpec((block_batch, S, F), lambda i: (i, 0, 0)),
            pl.BlockSpec((1, 1, F), lambda i: (0, 0, 0)),   # resident weight
            pl.BlockSpec((1, S, 1), lambda i: (0, 0, 0)),   # resident bias
        ],
        # For F a multiple of 128 (production sizes) this output block is
        # lane-dense / unmasked stores; for narrow F (e.g. the F=32 test) the
        # store is a masked vst, negligible next to the HBM-bound x stream.
        out_specs=pl.BlockSpec((block_batch, F), lambda i: (i, 0)),
        compiler_params=pltpu.CompilerParams(
            dimension_semantics=("parallel",),   # batch tiles are independent
            vmem_limit_bytes=vmem_limit_bytes,
        ),
    )(x, w3, b3)
    return out[:B]


def attention_ref(x, weight, bias):
    """Pure-JAX reference mirroring the PyTorch forward."""
    B, S, F = x.shape
    eij = (x.reshape(B * S, F) @ weight).reshape(B, S) + bias[None, :]
    eij = jnp.tanh(eij)
    a = jnp.exp(eij)
    a = a / jnp.sum(a, axis=1, keepdims=True) + 1e-10
    return jnp.sum(x * a[:, :, None], axis=1)


if __name__ == "__main__":
    feature_dim = 32
    step_dim = 8
    batch = 2

    key = jax.random.PRNGKey(0)
    kx, kw = jax.random.split(key)

    # input
    x = jax.random.normal(kx, (batch, step_dim, feature_dim), dtype=jnp.float32)

    # parameters (deterministic init):
    # xavier_uniform for weight (feature_dim, 1): U(-bound, bound),
    # bound = sqrt(6 / (fan_in + fan_out)) = sqrt(6 / (feature_dim + 1))
    bound = math.sqrt(6.0 / (feature_dim + 1))
    weight = jax.random.uniform(
        kw, (feature_dim, 1), minval=-bound, maxval=bound, dtype=jnp.float32
    )
    bias = jnp.zeros((step_dim,), dtype=jnp.float32)

    out = attention_forward(x, weight, bias)
    out = jax.block_until_ready(out)

    ref = attention_ref(x, weight, bias)
    assert out.shape == (batch, feature_dim)
    # Tolerance is slightly looser than strict f32 only because the kernel uses
    # the EUP approximate reciprocal for the softmax denominator.
    assert jnp.allclose(out, ref, atol=2e-3, rtol=2e-3), float(
        jnp.max(jnp.abs(out - ref))
    )

    print("KERNEL_OK")
</pallas_src>

<mosaic_0001>
module attributes {stable_mosaic.version = 11 : i64} {
  func.func @attention_kernel(%arg0: i32, %arg1: memref<8x8x32xf32, #tpu.memory_space<vmem>>, %arg2: memref<1x1x32xf32, #tpu.memory_space<vmem>>, %arg3: memref<1x8x1xf32, #tpu.memory_space<vmem>>, %arg4: memref<8x32xf32, #tpu.memory_space<vmem>>) attributes {dimension_semantics = [#tpu.dimension_semantics<parallel>], iteration_bounds = array<i64: 1>, scalar_prefetch = 0 : i64, scratch_operands = 0 : i64, tpu.core_type = #tpu.core_type<tc>, window_params = [{transform_indices = @transform_0, window_bounds = array<i64: 8, 8, 32>}, {pipeline_mode = #tpu.pipeline_mode<synchronous>, transform_indices = @transform_1, window_bounds = array<i64: 1, 1, 32>}, {pipeline_mode = #tpu.pipeline_mode<synchronous>, transform_indices = @transform_2, window_bounds = array<i64: 1, 8, 1>}, {transform_indices = @transform_3, window_bounds = array<i64: 8, 32>}]} {
    %c0 = arith.constant 0 : index
    %c0_0 = arith.constant 0 : index
    %c0_1 = arith.constant 0 : index
    %0 = vector.load %arg1[%c0, %c0_0, %c0_1] : memref<8x8x32xf32, #tpu.memory_space<vmem>>, vector<8x8x32xf32>
    %c0_2 = arith.constant 0 : index
    %c0_3 = arith.constant 0 : index
    %c0_4 = arith.constant 0 : index
    %1 = vector.load %arg2[%c0_2, %c0_3, %c0_4] : memref<1x1x32xf32, #tpu.memory_space<vmem>>, vector<1x1x32xf32>
    %c0_5 = arith.constant 0 : index
    %c0_6 = arith.constant 0 : index
    %c0_7 = arith.constant 0 : index
    %2 = vector.load %arg3[%c0_5, %c0_6, %c0_7] : memref<1x8x1xf32, #tpu.memory_space<vmem>>, vector<1x8x1xf32>
    %3 = vector.broadcast %1 : vector<1x1x32xf32> to vector<8x8x32xf32>
    %4 = arith.mulf %0, %3 : vector<8x8x32xf32>
    %cst = arith.constant dense<0.000000e+00> : vector<8x8xf32>
    %5 = vector.multi_reduction <add>, %4, %cst [2] : vector<8x8x32xf32> to vector<8x8xf32>
    %6 = vector.shape_cast %5 : vector<8x8xf32> to vector<8x8x1xf32>
    %7 = vector.broadcast %2 : vector<1x8x1xf32> to vector<8x8x1xf32>
    %8 = arith.addf %6, %7 : vector<8x8x1xf32>
    %9 = math.tanh %8 : vector<8x8x1xf32>
    %10 = math.exp %9 : vector<8x8x1xf32>
    %cst_8 = arith.constant dense<0.000000e+00> : vector<8x1xf32>
    %11 = vector.multi_reduction <add>, %10, %cst_8 [1] : vector<8x8x1xf32> to vector<8x1xf32>
    %12 = vector.shape_cast %11 : vector<8x1xf32> to vector<8x1x1xf32>
    %13 = tpu.reciprocal %12 {approx = true} : vector<8x1x1xf32> -> vector<8x1x1xf32>
    %14 = vector.broadcast %13 : vector<8x1x1xf32> to vector<8x8x1xf32>
    %15 = arith.mulf %10, %14 : vector<8x8x1xf32>
    %cst_9 = arith.constant 1.000000e-10 : f32
    %16 = vector.broadcast %cst_9 : f32 to vector<8x8x1xf32>
    %17 = arith.addf %15, %16 : vector<8x8x1xf32>
    %18 = vector.broadcast %17 : vector<8x8x1xf32> to vector<8x8x32xf32>
    %19 = arith.mulf %0, %18 : vector<8x8x32xf32>
    %cst_10 = arith.constant dense<0.000000e+00> : vector<8x32xf32>
    %20 = vector.multi_reduction <add>, %19, %cst_10 [1] : vector<8x8x32xf32> to vector<8x32xf32>
    %c0_11 = arith.constant 0 : index
    %c0_12 = arith.constant 0 : index
    %21 = vector.load %arg4[%c0_11, %c0_12] : memref<8x32xf32, #tpu.memory_space<vmem>>, vector<8x32xf32>
    tpu.vector_store %arg4[%c0_11, %c0_12], %20 {strides = array<i32>} : memref<8x32xf32, #tpu.memory_space<vmem>>, vector<8x32xf32>,
    return
  }
  func.func @transform_0(%arg0: i32) -> (i32, i32, i32) {
    %c0_i32 = arith.constant 0 : i32
    %c0_i32_0 = arith.constant 0 : i32
    %c0_i32_1 = arith.constant 0 : i32
    return %arg0, %c0_i32, %c0_i32_0 : i32, i32, i32
  }
  func.func @transform_1(%arg0: i32) -> (i32, i32, i32) {
    %c0_i32 = arith.constant 0 : i32
    %c0_i32_0 = arith.constant 0 : i32
    %c0_i32_1 = arith.constant 0 : i32
    %c0_i32_2 = arith.constant 0 : i32
    return %c0_i32, %c0_i32_0, %c0_i32_1 : i32, i32, i32
  }
  func.func @transform_2(%arg0: i32) -> (i32, i32, i32) {
    %c0_i32 = arith.constant 0 : i32
    %c0_i32_0 = arith.constant 0 : i32
    %c0_i32_1 = arith.constant 0 : i32
    %c0_i32_2 = arith.constant 0 : i32
    return %c0_i32, %c0_i32_0, %c0_i32_1 : i32, i32, i32
  }
  func.func @transform_3(%arg0: i32) -> (i32, i32) {
    %c0_i32 = arith.constant 0 : i32
    %c0_i32_0 = arith.constant 0 : i32
    return %arg0, %c0_i32 : i32, i32
  }
}

</mosaic_0001>

<bundles_post_ra>
// kernel: tpu_custom_call.1
= control target key start
LH: loop header
LB: loop body
LE: loop exit
PB: predicated region body
PF: predicated region fallthrough
CT: control target
= control target key end

     0   :  { %8 = vsyncpa [#allocation3], 0  ;;  %s578_s0 = inlined_call_operand.hbm [shape: f32[8,8,32], index: 0, kind: input, shape index: {}]   ;;  %s579_s1 = inlined_call_operand.vmem [shape: f32[1,1,32], index: 1, kind: input, shape index: {}]   ;;  %s580_s2 = inlined_call_operand.vmem [shape: f32[1,8,1], index: 2, kind: input, shape index: {}]   ;;  %s581_s3 = inlined_call_operand.hbm [shape: f32[8,32], index: 3, kind: output, shape index: {}]  }
   0x1   :  { %9 = vsyncpa [#allocation4], 0  ;;  %s438_s12 = smov [#allocation2]   ;;  %s390_s16 = scalar_lea.hbm %s578_s0, 1024 }
   0x2   :  { %s15_s13 = sshll.u32 %s438_s12, 4  ;;  %p391_p0 = scmp.ne.s32.totalorder %s578_s0, %s390_s16  ;;  %s16_s13 = int_to_ptr.vmem [resolvable:$true] %s15_s13 }
   0x3   :  { %p394_p1 = scmp.lt.u32.totalorder %s390_s16, %s578_s0 }
   0x5   :  { %p396_p2 = pnand %p394_p1, %p391_p0 }
   0x7   :  { %399 = shalt.err (!%p396_p2)
}
   0x8   :  { %s400_s21 = scalar_lea.vmem %s16_s13, 1024  ;;  %p405_p4 = scmp.lt.s32.totalorder %s16_s13, %s16_s13 }
   0x9   :  { %p401_p3 = scmp.ne.s32.totalorder %s16_s13, %s400_s21  ;;  %p406_p5 = scmp.lt.s32.totalorder %s400_s21, %s400_s21 }
   0xb   :  { %p407_p6 = por %p406_p5, %p405_p4 }
   0xd   :  { %p408_p7 = pnand %p407_p6, %p401_p3 }
   0xf   :  { %411 = shalt.err (!%p408_p7)
}
  0x10   :  { %s439_s22 = smov 128   ;;  %s440_s23 = smov 8  }
  0x11   :  { %21 = dma.hbm_to_vmem [thread:$0]  %s578_s0, 1024, %s16_s13, [#allocation3], %s439_s22, %s439_s22, %s440_s23  }
  0x12   :  { %434 = dma.done.wait [#allocation3], 1024  }
  0x13   :  { %435 = vsyncadd [#allocation3], 4294966272  ;;  %v475_v0 = vld [vmem:[#allocation2 + $0x10] sm:$0xff]  ;;  %v334_v1 = vld [vmem:[%s579_s1] ss:$0 sm:$0xff]  ;;  %vm53_vm0 = vcmask 261120  }
  0x14   :  { %v480_v2 = vld [vmem:[#allocation2] sm:$0xff]  ;;  %v47_v3 = vmul.f32 %v334_v1, %v475_v0  ;;  %v484_v5 = vld [vmem:[#allocation2 + $0x18] sm:$0xff]  ;;  %v486_v6 = vld [vmem:[#allocation2 + $0x8] sm:$0xff]  ;;  %v441_v25 = vmov 0   ;;  %vm110_vm1 = vcmask 7168   ;;  %vm303_vm2 = vcmask 1041409  }
  0x15   :  { %v45_v4 = vmul.f32 %v334_v1, %v480_v2  ;;  %v48_v7 = vmul.f32 %v334_v1, %v484_v5  ;;  %v46_v8 = vmul.f32 %v334_v1, %v486_v6  ;;  %v490_v9 = vld [vmem:[#allocation2 + $0x28] sm:$0xff]  ;;  %v492_v10 = vld [vmem:[#allocation2 + $0x20] sm:$0xff]  ;;  %v500_v17 = vld [vmem:[#allocation2 + $0x38] sm:$0xff]  ;;  %340 = vset.pattern.permute.xlu0 %v441_v25  ;;  %341 = vset.pattern.permute.xlu1 %v441_v25  ;;  %vm305_vm3 = vcmask 1042434  }
  0x16   :  { %v60_v11 = vsel %vm53_vm0, %v47_v3, 0.0  ;;  %v50_v15 = vmul.f32 %v334_v1, %v490_v9  ;;  %v49_v16 = vmul.f32 %v334_v1, %v492_v10  ;;  %v502_v18 = vld [vmem:[#allocation2 + $0x30] sm:$0xff]  ;;  %v52_v21 = vmul.f32 %v334_v1, %v500_v17  ;;  %v38_v26 = vld [vmem:[%s580_s2] sm:$0xff]  ;;  %s442_s2 = smov [#allocation5]  }
  0x17   :  { %v54_v12 = vsel %vm53_vm0, %v45_v4, 0.0  ;;  %61 = vadd.xlane.f32.xlu1 %v60_v11  ;;  %v63_v13 = vsel %vm53_vm0, %v48_v7, 0.0  ;;  %v57_v14 = vsel %vm53_vm0, %v46_v8, 0.0  ;;  %v51_v22 = vmul.f32 %v334_v1, %v502_v18  ;;  %s325_s28 = sshll.u32 %s442_s2, 4  ;;  %s326_s28 = int_to_ptr.vmem [resolvable:$true] %s325_s28 }
  0x18   :  { %55 = vadd.xlane.f32.xlu0 %v54_v12  ;;  %v69_v19 = vsel %vm53_vm0, %v50_v15, 0.0  ;;  %v66_v20 = vsel %vm53_vm0, %v49_v16, 0.0  ;;  %v75_v23 = vsel %vm53_vm0, %v52_v21, 0.0  ;;  %vm307_vm4 = vcmask 1043459   ;;  %s412_s29 = scalar_lea.vmem %s326_s28, 128  ;;  %p417_p9 = scmp.lt.s32.totalorder %s326_s28, %s326_s28 }
  0x19   :  { %v72_v24 = vsel %vm53_vm0, %v51_v22, 0.0  ;;  %vm309_vm5 = vcmask 1044484   ;;  %vm311_vm6 = vcmask 1045509   ;;  %vm313_vm7 = vcmask 1046534   ;;  %p413_p8 = scmp.ne.s32.totalorder %s326_s28, %s412_s29  ;;  %p418_p10 = scmp.lt.s32.totalorder %s412_s29, %s412_s29 }
  0x1a   :  { %vm315_vm8 = vcmask 1047559  }
  0x1b   :  { %64 = vadd.xlane.f32.xlu1 %v63_v13  ;;  %p419_p11 = por %p418_p10, %p417_p9 }
  0x1c   :  { %58 = vadd.xlane.f32.xlu0 %v57_v14 }
  0x1d   :  { %p420_p12 = pnand %p419_p11, %p413_p8 }
  0x1f   :  { %70 = vadd.xlane.f32.xlu1 %v69_v19 }
  0x20   :  { %67 = vadd.xlane.f32.xlu0 %v66_v20 }
  0x23   :  { %76 = vadd.xlane.f32.xlu1 %v75_v23 }
  0x24   :  { %73 = vadd.xlane.f32.xlu0 %v72_v24 }
  0xa4   :  { %v62_v27 = vpop.xlane.xlu1 %61 }
  0xa5   :  { %v56_v28 = vpop.xlane.xlu0 %55  ;;  %v80_v29 = vadd.f32 %v62_v27, %v38_v26 }
  0xa6   :  { %v78_v30 = vadd.f32 %v56_v28, %v38_v26 }
  0xa7   :  { %342 = vtanh.f32 %v80_v29 }
  0xa8   :  { %344 = vtanh.f32 %v78_v30  ;;  %v65_v31 = vpop.xlane.xlu1 %64 }
  0xa9   :  { %v59_v32 = vpop.xlane.xlu0 %58  ;;  %v81_v33 = vadd.f32 %v65_v31, %v38_v26 }
  0xaa   :  { %v79_v34 = vadd.f32 %v59_v32, %v38_v26 }
  0xab   :  { %346 = vtanh.f32 %v81_v33 }
  0xac   :  { %348 = vtanh.f32 %v79_v34  ;;  %v71_v35 = vpop.xlane.xlu1 %70 }
  0xad   :  { %v68_v36 = vpop.xlane.xlu0 %67  ;;  %v83_v37 = vadd.f32 %v71_v35, %v38_v26 }
  0xae   :  { %v82_v38 = vadd.f32 %v68_v36, %v38_v26 }
  0xaf   :  { %350 = vtanh.f32 %v83_v37 }
  0xb0   :  { %352 = vtanh.f32 %v82_v38  ;;  %v77_v39 = vpop.xlane.xlu1 %76 }
  0xb1   :  { %v74_v40 = vpop.xlane.xlu0 %73  ;;  %v343_v41 = vpop.eup %342  ;;  %v85_v42 = vadd.f32 %v77_v39, %v38_v26 }
  0xb2   :  { %v345_v43 = vpop.eup %344  ;;  %v98_v44 = vmul.f32 1.442695, %v343_v41  ;;  %v84_v45 = vadd.f32 %v74_v40, %v38_v26 }
  0xb3   :  { %v94_v46 = vmul.f32 1.442695, %v345_v43  ;;  %354 = vtanh.f32 %v85_v42 }
  0xb4   :  { %356 = vpow2.f32 %v98_v44 }
  0xb5   :  { %v347_v47 = vpop.eup %346  ;;  %358 = vpow2.f32 %v94_v46 }
  0xb6   :  { %v349_v48 = vpop.eup %348  ;;  %v100_v49 = vmul.f32 1.442695, %v347_v47  ;;  %360 = vtanh.f32 %v84_v45 }
  0xb7   :  { %v96_v50 = vmul.f32 1.442695, %v349_v48 }
  0xb8   :  { %362 = vpow2.f32 %v100_v49 }
  0xb9   :  { %v351_v51 = vpop.eup %350  ;;  %364 = vpow2.f32 %v96_v50 }
  0xba   :  { %v353_v52 = vpop.eup %352  ;;  %v104_v53 = vmul.f32 1.442695, %v351_v51 }
  0xbb   :  { %v102_v54 = vmul.f32 1.442695, %v353_v52 }
  0xbc   :  { %366 = vpow2.f32 %v104_v53 }
  0xbd   :  { %v355_v55 = vpop.eup %354  ;;  %368 = vpow2.f32 %v102_v54 }
  0xbe   :  { %v513_v56 = vpop.eup %356  ;;  %v108_v57 = vmul.f32 1.442695, %v355_v55 }
  0xbf   :  { %v515_v58 = vpop.eup %358  ;;  %v125_v59 = vsel %vm110_vm1, %v513_v56, 0.0 }
  0xc0   :  { %v361_v60 = vpop.eup %360  ;;  %v126_v61 = vrot.slane %v125_v59, 4  ;;  %v111_v62 = vsel %vm110_vm1, %v515_v58, 0.0  ;;  %370 = vpow2.f32 %v108_v57 }
  0xc1   :  { %v112_v63 = vrot.slane %v111_v62, 4  ;;  %v106_v1 = vmul.f32 1.442695, %v361_v60 }
  0xc2   :  { %v521_v3 = vpop.eup %362  ;;  %v127_v4 = vadd.f32 %v126_v61, %v125_v59 }
  0xc3   :  { %v523_v7 = vpop.eup %364  ;;  %v113_v8 = vadd.f32 %v112_v63, %v111_v62  ;;  %v132_v11 = vsel %vm110_vm1, %v521_v3, 0.0  ;;  %372 = vpow2.f32 %v106_v1 }
  0xc4   :  { %v128_v12 = vrot.slane %v127_v4, 2  ;;  %v133_v13 = vrot.slane %v132_v11, 4  ;;  %v118_v14 = vsel %vm110_vm1, %v523_v7, 0.0 }
  0xc5   :  { %v114_v15 = vrot.slane %v113_v8, 2  ;;  %v119_v16 = vrot.slane %v118_v14, 4 }
  0xc6   :  { %v529_v19 = vpop.eup %366  ;;  %v134_v20 = vadd.f32 %v133_v13, %v132_v11  ;;  %v129_v21 = vadd.f32 %v128_v12, %v127_v4 }
  0xc7   :  { %v531_v22 = vpop.eup %368  ;;  %v120_v23 = vadd.f32 %v119_v16, %v118_v14  ;;  %v146_v24 = vsel %vm110_vm1, %v529_v19, 0.0  ;;  %v115_v25 = vadd.f32 %v114_v15, %v113_v8 }
  0xc8   :  { %v135_v26 = vrot.slane %v134_v20, 2  ;;  %v147_v27 = vrot.slane %v146_v24, 4  ;;  %v139_v28 = vsel %vm110_vm1, %v531_v22, 0.0  ;;  %v130_v29 = vrot.slane %v129_v21, 1 }
  0xc9   :  { %v121_v30 = vrot.slane %v120_v23, 2  ;;  %v140_v31 = vrot.slane %v139_v28, 4  ;;  %v116_v32 = vrot.slane %v115_v25, 1 }
  0xca   :  { %v537_v33 = vpop.eup %370  ;;  %v148_v34 = vadd.f32 %v147_v27, %v146_v24  ;;  %v136_v35 = vadd.f32 %v135_v26, %v134_v20  ;;  %v131_v41 = vadd.f32 %v130_v29, %v129_v21 }
  0xcb   :  { %v141_v36 = vadd.f32 %v140_v31, %v139_v28  ;;  %v160_v37 = vsel %vm110_vm1, %v537_v33, 0.0  ;;  %v117_v38 = vadd.f32 %v116_v32, %v115_v25  ;;  %v122_v39 = vadd.f32 %v121_v30, %v120_v23 }
  0xcc   :  { %v161_v40 = vrot.slane %v160_v37, 4  ;;  %v137_v42 = vrot.slane %v136_v35, 1  ;;  %v149_v44 = vrot.slane %v148_v34, 2 }
  0xcd   :  { %v373_v43 = vpop.eup %372  ;;  %v142_v45 = vrot.slane %v141_v36, 2  ;;  %374 = vrcp.f32 %v117_v38  ;;  %v123_v46 = vrot.slane %v122_v39, 1 }
  0xce   :  { %v153_v47 = vsel %vm110_vm1, %v373_v43, 0.0  ;;  %v162_v51 = vadd.f32 %v161_v40, %v160_v37  ;;  %376 = vrcp.f32 %v131_v41  ;;  %v138_v52 = vadd.f32 %v137_v42, %v136_v35 }
  0xcf   :  { %v154_v48 = vrot.slane %v153_v47, 4  ;;  %v124_v49 = vadd.f32 %v123_v46, %v122_v39  ;;  %v143_v50 = vadd.f32 %v142_v45, %v141_v36  ;;  %v150_v55 = vadd.f32 %v149_v44, %v148_v34 }
  0xd0   :  { %v163_v59 = vrot.slane %v162_v51, 2 }
  0xd1   :  { %v155_v53 = vadd.f32 %v154_v48, %v153_v47  ;;  %378 = vrcp.f32 %v124_v49  ;;  %v144_v54 = vrot.slane %v143_v50, 1  ;;  %v151_v61 = vrot.slane %v150_v55, 1 }
  0xd2   :  { %380 = vrcp.f32 %v138_v52  ;;  %v164_v11 = vadd.f32 %v163_v59, %v162_v51 }
  0xd3   :  { %v156_v57 = vrot.slane %v155_v53, 2  ;;  %v145_v60 = vadd.f32 %v144_v54, %v143_v50  ;;  %v152_v4 = vadd.f32 %v151_v61, %v150_v55 }
  0xd4   :  { %v165_v20 = vrot.slane %v164_v11, 1 }
  0xd5   :  { %v157_v62 = vadd.f32 %v156_v57, %v155_v53  ;;  %382 = vrcp.f32 %v145_v60 }
  0xd6   :  { %384 = vrcp.f32 %v152_v4 }
  0xd7   :  { %v375_v63 = vpop.eup %374  ;;  %v158_v8 = vrot.slane %v157_v62, 1 }
  0xd8   :  { %v175_v1 = vmul.f32 %v375_v63, %v515_v58  ;;  %v377_v12 = vpop.eup %376  ;;  %v166_v58 = vadd.f32 %v165_v20, %v164_v11 }
  0xd9   :  { %v159_v16 = vadd.f32 %v158_v8, %v157_v62  ;;  %v177_v23 = vmul.f32 %v377_v12, %v513_v56 }
  0xda   :  { %v183_v13 = vadd.f32 1e-10, %v175_v1 }
  0xdb   :  { %v379_v14 = vpop.eup %378  ;;  %386 = vrcp.f32 %v159_v16  ;;  %v185_v25 = vadd.f32 1e-10, %v177_v23 }
  0xdc   :  { %193 = vperm.xlu0 %340, %v183_v13   ;;  %v176_v15 = vmul.f32 %v379_v14, %v523_v7  ;;  %v381_v24 = vpop.eup %380  ;;  %388 = vrcp.f32 %v166_v58 }
  0xdd   :  { %v178_v26 = vmul.f32 %v381_v24, %v521_v3 }
  0xde   :  { %v184_v21 = vadd.f32 1e-10, %v176_v15 }
  0xdf   :  { %v383_v27 = vpop.eup %382  ;;  %v186_v28 = vadd.f32 1e-10, %v178_v26 }
  0xe0   :  { %198 = vperm.xlu1 %341, %v184_v21   ;;  %v179_v29 = vmul.f32 %v383_v27, %v531_v22  ;;  %v385_v7 = vpop.eup %384 }
  0xe1   :  { %v180_v31 = vmul.f32 %v385_v7, %v529_v19 }
  0xe2   :  { %v187_v30 = vadd.f32 1e-10, %v179_v29 }
  0xe3   :  { %v188_v56 = vadd.f32 1e-10, %v180_v31 }
  0xe4   :  { %203 = vperm.xlu1 %341, %v185_v25  }
  0xe5   :  { %v387_v32 = vpop.eup %386 }
  0xe6   :  { %v181_v34 = vmul.f32 %v387_v32, %v373_v43  ;;  %v389_v35 = vpop.eup %388 }
  0xe7   :  { %v182_v3 = vmul.f32 %v389_v35, %v537_v33 }
  0xe8   :  { %208 = vperm.xlu1 %341, %v186_v28   ;;  %v189_v36 = vadd.f32 1e-10, %v181_v34 }
  0xe9   :  { %v190_v37 = vadd.f32 1e-10, %v182_v3 }
  0xec   :  { %213 = vperm.xlu1 %341, %v187_v30  }
  0xf0   :  { %218 = vperm.xlu1 %341, %v188_v56  }
  0xf4   :  { %223 = vperm.xlu1 %341, %v189_v36  }
  0xf8   :  { %228 = vperm.xlu1 %341, %v190_v37  }
 0x15b   :  { %v194_v39 = vpop.permute.xlu0 %193 }
 0x15c   :  { %v231_v41 = vmul.f32 %v194_v39, %v480_v2 }
 0x15e   :  { %v239_v45 = vsel %vm53_vm0, %v231_v41, 0.0 }
 0x15f   :  { %v199_v38 = vpop.permute.xlu1 %198  ;;  %v240_v49 = vrot.slane %v239_v45, 4 }
 0x160   :  { %v232_v22 = vmul.f32 %v199_v38, %v486_v6 }
 0x161   :  { %v241_v53 = vadd.f32 %v240_v49, %v239_v45 }
 0x162   :  { %v246_v42 = vsel %vm53_vm0, %v232_v22, 0.0 }
 0x163   :  { %v204_v40 = vpop.permute.xlu1 %203  ;;  %v247_v46 = vrot.slane %v246_v42, 4  ;;  %v242_v63 = vrot.slane %v241_v53, 2 }
 0x164   :  { %v233_v19 = vmul.f32 %v204_v40, %v475_v0 }
 0x165   :  { %v248_v51 = vadd.f32 %v247_v46, %v246_v42  ;;  %v243_v16 = vadd.f32 %v242_v63, %v241_v53 }
 0x166   :  { %v253_v43 = vsel %vm53_vm0, %v233_v19, 0.0 }
 0x167   :  { %v209_v44 = vpop.permute.xlu1 %208  ;;  %v254_v47 = vrot.slane %v253_v43, 4 }
 0x168   :  { %v234_v33 = vmul.f32 %v209_v44, %v484_v5  ;;  %v249_v5 = vrot.slane %v248_v51, 2 }
 0x169   :  { %v255_v0 = vadd.f32 %v254_v47, %v253_v43 }
 0x16a   :  { %v260_v48 = vsel %vm53_vm0, %v234_v33, 0.0  ;;  %v250_v12 = vadd.f32 %v249_v5, %v248_v51 }
 0x16b   :  { %v261_v6 = vrot.slane %v260_v48, 4  ;;  %v214_v50 = vpop.permute.xlu1 %213  ;;  %v256_v61 = vrot.slane %v255_v0, 2 }
 0x16c   :  { %v235_v2 = vmul.f32 %v214_v50, %v492_v10  ;;  %v251_v25 = vrot.slane %v250_v12, 1 }
 0x16d   :  { %v262_v54 = vadd.f32 %v261_v6, %v260_v48  ;;  %v257_v14 = vadd.f32 %v256_v61, %v255_v0 }
 0x16e   :  { %v267_v52 = vsel %vm53_vm0, %v235_v2, 0.0  ;;  %v252_v56 = vadd.f32 %v251_v25, %v250_v12 }
 0x16f   :  { %v268_v55 = vrot.slane %v267_v52, 4  ;;  %v219_v57 = vpop.permute.xlu1 %218  ;;  %v263_v1 = vrot.slane %v262_v54, 2  ;;  %v258_v28 = vrot.slane %v257_v14, 1 }
 0x170   :  { %v236_v59 = vmul.f32 %v219_v57, %v490_v9 }
 0x171   :  { %v269_v60 = vadd.f32 %v268_v55, %v267_v52  ;;  %v264_v20 = vadd.f32 %v263_v1, %v262_v54  ;;  %v259_v3 = vadd.f32 %v258_v28, %v257_v14 }
 0x172   :  { %v274_v62 = vsel %vm53_vm0, %v236_v59, 0.0 }
 0x173   :  { %v275_v4 = vrot.slane %v274_v62, 4  ;;  %v224_v8 = vpop.permute.xlu1 %223  ;;  %v270_v10 = vrot.slane %v269_v60, 2  ;;  %v265_v7 = vrot.slane %v264_v20, 1 }
 0x174   :  { %v237_v11 = vmul.f32 %v224_v8, %v502_v18  ;;  %v244_v18 = vrot.slane %v243_v16, 1 }
 0x175   :  { %v276_v13 = vadd.f32 %v275_v4, %v274_v62  ;;  %v271_v24 = vadd.f32 %v270_v10, %v269_v60 }
 0x176   :  { %v281_v15 = vsel %vm53_vm0, %v237_v11, 0.0  ;;  %v245_v37 = vadd.f32 %v244_v18, %v243_v16 }
 0x177   :  { %v277_v9 = vrot.slane %v276_v13, 2  ;;  %v282_v21 = vrot.slane %v281_v15, 4  ;;  %v229_v23 = vpop.permute.xlu1 %228  ;;  %v272_v32 = vrot.slane %v271_v24, 1 }
 0x178   :  { %v238_v58 = vmul.f32 %v229_v23, %v500_v17  ;;  %v266_v17 = vadd.f32 %v265_v7, %v264_v20  ;;  %v304_v40 = vsel %vm303_vm2, %v252_v56, %v245_v37 }
 0x179   :  { %v278_v26 = vadd.f32 %v277_v9, %v276_v13  ;;  %v283_v27 = vadd.f32 %v282_v21, %v281_v15  ;;  %v273_v22 = vadd.f32 %v272_v32, %v271_v24  ;;  %v306_v42 = vsel %vm305_vm3, %v259_v3, %v304_v40 }
 0x17a   :  { %v288_v29 = vsel %vm53_vm0, %v238_v58, 0.0  ;;  %v308_v44 = vsel %vm307_vm4, %v266_v17, %v306_v42 }
 0x17b   :  { %v284_v30 = vrot.slane %v283_v27, 2  ;;  %v289_v31 = vrot.slane %v288_v29, 4  ;;  %v279_v34 = vrot.slane %v278_v26, 1  ;;  %v310_v33 = vsel %vm309_vm5, %v273_v22, %v308_v44 }
 0x17d   :  { %v285_v35 = vadd.f32 %v284_v30, %v283_v27  ;;  %v290_v36 = vadd.f32 %v289_v31, %v288_v29  ;;  %v280_v41 = vadd.f32 %v279_v34, %v278_v26 }
 0x17f   :  { %v286_v38 = vrot.slane %v285_v35, 1  ;;  %v291_v39 = vrot.slane %v290_v36, 2  ;;  %v312_v47 = vsel %vm311_vm6, %v280_v41, %v310_v33 }
 0x181   :  { %v292_v19 = vadd.f32 %v291_v39, %v290_v36  ;;  %v287_v43 = vadd.f32 %v286_v38, %v285_v35 }
 0x183   :  { %v293_v45 = vrot.slane %v292_v19, 1  ;;  %v314_v48 = vsel %vm313_vm7, %v287_v43, %v312_v47 }
 0x185   :  { %v294_v46 = vadd.f32 %v293_v45, %v292_v19 }
 0x187   :  { %v316_v49 = vsel %vm315_vm8, %v294_v46, %v314_v48 }
 0x188   :  { %318 = vst.msk [vmem:[#allocation5] sm:$0xff] %vm53_vm0, %v316_v49 }
 0x189   :  { %423 = shalt.err (!%p420_p12)
}
 0x18a   :  { %s424_s5 = scalar_lea.hbm %s581_s3, 128 }
 0x18b   :  { %p425_p13 = scmp.ne.s32.totalorder %s581_s3, %s424_s5  ;;  %p428_p0 = scmp.lt.u32.totalorder %s424_s5, %s581_s3 }
 0x18d   :  { %p430_p1 = pnand %p428_p0, %p425_p13 }
 0x18f   :  { %433 = shalt.err (!%p430_p1)
}
 0x190   :  { %328 = dma.vmem_to_hbm [thread:$0]  %s326_s28, 128, %s581_s3, [#allocation4]  }
 0x191   :  { %436 = dma.done.wait [#allocation4], 128  }
 0x192   :  { %437 = vsyncadd [#allocation4], 4294967168 }
 0x193   :  { %332 = vsyncpa [#allocation3], 1 }
 0x194   :  { %333 = vsyncpa [#allocation4], 1 }

</bundles_post_ra>
